<compile_context>
chip_gen: v7x
topology: tpu7x:2x2x1
jax: 0.10.0
libtpu: 0.0.40
codegen_flags: <defaults>
</compile_context>

<pallas_src>
import jax
import jax.numpy as jnp
from jax.experimental import pallas as pl
from jax.experimental.pallas import tpu as pltpu

NUM_CLASSES = 4
SMOOTH = 1e-5
LANES = 128
ROW_ALIGN = 32   # int8 sublane packing is (32, 128); also satisfies the f32 (8, 128) tile.


def _cdiv(a, b):
    return -(-a // b)


def _round_up(a, m):
    return _cdiv(a, m) * m


def _vmem_capacity_bytes():
    try:
        info = pltpu.get_tpu_info()
        cap = getattr(info, "vmem_capacity_bytes", None)
        if cap:
            return int(cap)
    except Exception:
        pass
    return None


def _make_iou_kernel(C):
    def kernel(pred_ref, tgt_ref, inter_ref, union_ref,
               inter_acc, pred_acc, tgt_acc):
        si = pl.program_id(1)

        @pl.when(si == 0)
        def _init():
            inter_acc[...] = jnp.zeros_like(inter_acc)
            pred_acc[...] = jnp.zeros_like(pred_acc)
            tgt_acc[...] = jnp.zeros_like(tgt_acc)

        x = pred_ref[...].astype(jnp.float32)        # (TB, C, TR, 128)
        t = tgt_ref[...].astype(jnp.int32)           # (TB, TR, 128)

        # Softmax over the channel axis (C slabs; cheap cross-slab VPU ops).
        m = jnp.max(x, axis=1, keepdims=True)
        e = jnp.exp(x - m)                           # EUP
        d = jnp.sum(e, axis=1, keepdims=True)        # (TB, 1, TR, 128)
        r = pl.reciprocal(d, approx=True)            # EUP vrcp (own bundle slot)
        r = r * (2.0 - d * r)                        # one Newton step -> ~eps^2 error
        r = r[:, 0]                                  # (TB, TR, 128)

        # Per-class partial sums, keeping the lane axis (cross-lane reduce deferred
        # to the last spatial step).  Only one (TB, TR, 128) slab of one-hot /
        # softmax data is live at a time -> no block-sized one-hot intermediate.
        for c in range(C):
            p_c = e[:, c] * r                        # softmax prob of class c
            m_c = (t == c).astype(jnp.float32)       # one-hot slab (0 for padded pixels)
            inter_acc[:, c, :] = inter_acc[:, c, :] + jnp.sum(p_c * m_c, axis=1)
            pred_acc[:, c, :] = pred_acc[:, c, :] + jnp.sum(p_c, axis=1)
            tgt_acc[:, c, :] = tgt_acc[:, c, :] + jnp.sum(m_c, axis=1)

        @pl.when(si == pl.num_programs(1) - 1)
        def _finalize():
            inter = jnp.sum(inter_acc[...], axis=-1)   # (TB, C)
            pred = jnp.sum(pred_acc[...], axis=-1)
            tgt = jnp.sum(tgt_acc[...], axis=-1)
            inter_ref[...] = inter[None]
            union_ref[...] = (pred + tgt - inter)[None]

    return kernel


def iou_loss_pallas(predictions, targets, smooth=SMOOTH):
    """predictions: (B, C, H, W) float, targets: (B, H, W) int -> scalar loss."""
    B, C, H, W = predictions.shape
    hw = H * W

    # ---- generation-aware tile / VMEM budget --------------------------------
    cap = _vmem_capacity_bytes()
    if cap is None:
        # Unknown generation: conservative numbers valid on v5e..v7x.
        block_budget, vmem_limit = 6 * 2**20, 48 * 2**20
    elif cap <= 96 * 2**20:
        # v7x-class: 64 MiB VMEM per TensorCore.
        block_budget, vmem_limit = 5 * 2**20, min(cap * 3 // 4, 48 * 2**20)
    else:
        # v5e / v6e: 128 MiB VMEM.
        block_budget, vmem_limit = 8 * 2**20, 96 * 2**20

    # Batch tile of 1: the "parallel" grid axis has B steps, so v7x's two
    # TensorCores both get work whenever B >= 2 (single-core for B == 1).
    tb = 1
    rows_budget = max(
        ROW_ALIGN,
        (block_budget // (tb * C * LANES * 4)) // ROW_ALIGN * ROW_ALIGN)

    # ---- lane-dense spatial layout -------------------------------------------
    s_rows = _cdiv(hw, LANES)
    s_rows_al = _round_up(s_rows, ROW_ALIGN)
    if s_rows_al <= rows_budget:
        n_sb, tr = 1, s_rows_al
    else:
        # Balance tiles so tail padding stays under ROW_ALIGN rows per tile.
        n_sb = _cdiv(s_rows_al, rows_budget)
        tr = _round_up(_cdiv(s_rows_al, n_sb), ROW_ALIGN)
    s_rows_pad = n_sb * tr
    pad = s_rows_pad * LANES - hw

    tgt_dtype = jnp.int8 if C <= 127 else jnp.int32

    preds_flat = predictions.reshape(B, C, hw).astype(jnp.float32)
    tgts_flat = targets.reshape(B, hw).astype(tgt_dtype)
    if pad:
        # Zero-pad predictions (padded-pixel softmax is exactly 1/C; corrected in
        # the epilogue).  Pad targets with class C so they never match a one-hot.
        preds_flat = jnp.pad(preds_flat, ((0, 0), (0, 0), (0, pad)))
        tgts_flat = jnp.pad(tgts_flat, ((0, 0), (0, pad)), constant_values=C)

    preds_l = preds_flat.reshape(B, C, s_rows_pad, LANES)
    tgts_l = tgts_flat.reshape(B, s_rows_pad, LANES)

    n_bb = B // tb

    inter, union = pl.pallas_call(
        _make_iou_kernel(C),
        out_shape=(
            jax.ShapeDtypeStruct((n_bb, tb, C), jnp.float32),
            jax.ShapeDtypeStruct((n_bb, tb, C), jnp.float32),
        ),
        grid_spec=pltpu.PrefetchScalarGridSpec(
            num_scalar_prefetch=0,
            grid=(n_bb, n_sb),
            in_specs=[
                pl.BlockSpec((tb, C, tr, LANES), lambda bi, si: (bi, 0, si, 0)),
                pl.BlockSpec((tb, tr, LANES), lambda bi, si: (bi, si, 0)),
            ],
            out_specs=[
                pl.BlockSpec((1, tb, C), lambda bi, si: (bi, 0, 0)),
                pl.BlockSpec((1, tb, C), lambda bi, si: (bi, 0, 0)),
            ],
            scratch_shapes=[
                pltpu.VMEM((tb, C, LANES), jnp.float32),   # intersection lane accumulator
                pltpu.VMEM((tb, C, LANES), jnp.float32),   # softmax-prob lane accumulator
                pltpu.VMEM((tb, C, LANES), jnp.float32),   # one-hot target lane accumulator
            ],
        ),
        compiler_params=pltpu.CompilerParams(
            dimension_semantics=("parallel", "arbitrary"),
            vmem_limit_bytes=int(vmem_limit),
        ),
    )(preds_l, tgts_l)

    inter = inter.reshape(B, C)
    union = union.reshape(B, C)
    # Padded pixels contribute exactly 1/C each to pred_sum (hence to union);
    # subtract that compile-time constant instead of masking inside the kernel.
    union = union - (pad / C)
    iou = (inter + smooth) / (union + smooth)
    return 1.0 - jnp.mean(iou)


def iou_loss_ref(predictions, targets, num_classes=NUM_CLASSES, smooth=SMOOTH):
    """Pure-JAX reference mirroring the PyTorch module."""
    p = jax.nn.softmax(predictions, axis=1)                        # (B, C, H, W)
    t1h = jax.nn.one_hot(targets, num_classes, dtype=jnp.float32)  # (B, H, W, C)
    t1h = jnp.transpose(t1h, (0, 3, 1, 2))                         # (B, C, H, W)
    inter = jnp.sum(p * t1h, axis=(2, 3))                          # (B, C)
    union = jnp.sum(p, axis=(2, 3)) + jnp.sum(t1h, axis=(2, 3)) - inter
    iou = (inter + smooth) / (union + smooth)
    return 1.0 - jnp.mean(iou)


if __name__ == "__main__":
    key = jax.random.PRNGKey(0)
    k1, k2 = jax.random.split(key)
    B, C, H, W = 2, NUM_CLASSES, 16, 16
    predictions = jax.random.normal(k1, (B, C, H, W), dtype=jnp.float32)
    targets = jax.random.randint(k2, (B, H, W), 0, NUM_CLASSES, dtype=jnp.int32)

    loss = jax.block_until_ready(iou_loss_pallas(predictions, targets))
    ref = jax.block_until_ready(iou_loss_ref(predictions, targets))
    assert jnp.allclose(loss, ref, atol=1e-5, rtol=1e-5), (loss, ref)
    print("KERNEL_OK")
</pallas_src>

<mosaic_0001>
module attributes {stable_mosaic.version = 11 : i64} {
  func.func @kernel(%arg0: i32, %arg1: i32, %arg2: memref<1x4x32x128xf32, #tpu.memory_space<vmem>>, %arg3: memref<1x32x128xi8, #tpu.memory_space<vmem>>, %arg4: memref<1x1x4xf32, #tpu.memory_space<vmem>>, %arg5: memref<1x1x4xf32, #tpu.memory_space<vmem>>, %arg6: memref<1x4x128xf32, #tpu.memory_space<vmem>>, %arg7: memref<1x4x128xf32, #tpu.memory_space<vmem>>, %arg8: memref<1x4x128xf32, #tpu.memory_space<vmem>>) attributes {dimension_semantics = [#tpu.dimension_semantics<parallel>, #tpu.dimension_semantics<arbitrary>], iteration_bounds = array<i64: 2, 1>, scalar_prefetch = 0 : i64, scratch_operands = 3 : i64, tpu.core_type = #tpu.core_type<tc>, window_params = [{transform_indices = @transform_0, window_bounds = array<i64: 1, 4, 32, 128>}, {transform_indices = @transform_1, window_bounds = array<i64: 1, 32, 128>}, {transform_indices = @transform_2, window_bounds = array<i64: 1, 1, 4>}, {transform_indices = @transform_3, window_bounds = array<i64: 1, 1, 4>}]} {
    %c0_i32 = arith.constant 0 : i32
    %0 = arith.cmpi eq, %arg1, %c0_i32 : i32
    %1 = arith.extui %0 : i1 to i32
    %c0_i32_0 = arith.constant 0 : i32
    %2 = arith.cmpi ne, %1, %c0_i32_0 : i32
    scf.if %2 {
      %cst_93 = arith.constant 0.000000e+00 : f32
      %138 = vector.broadcast %cst_93 : f32 to vector<1x4x128xf32>
      %c0_94 = arith.constant 0 : index
      %c0_95 = arith.constant 0 : index
      %c0_96 = arith.constant 0 : index
      %139 = vector.load %arg6[%c0_94, %c0_95, %c0_96] : memref<1x4x128xf32, #tpu.memory_space<vmem>>, vector<1x4x128xf32>
      tpu.vector_store %arg6[%c0_94, %c0_95, %c0_96], %138 {strides = array<i32>} : memref<1x4x128xf32, #tpu.memory_space<vmem>>, vector<1x4x128xf32>,
      %cst_97 = arith.constant 0.000000e+00 : f32
      %140 = vector.broadcast %cst_97 : f32 to vector<1x4x128xf32>
      %c0_98 = arith.constant 0 : index
      %c0_99 = arith.constant 0 : index
      %c0_100 = arith.constant 0 : index
      %141 = vector.load %arg7[%c0_98, %c0_99, %c0_100] : memref<1x4x128xf32, #tpu.memory_space<vmem>>, vector<1x4x128xf32>
      tpu.vector_store %arg7[%c0_98, %c0_99, %c0_100], %140 {strides = array<i32>} : memref<1x4x128xf32, #tpu.memory_space<vmem>>, vector<1x4x128xf32>,
      %cst_101 = arith.constant 0.000000e+00 : f32
      %142 = vector.broadcast %cst_101 : f32 to vector<1x4x128xf32>
      %c0_102 = arith.constant 0 : index
      %c0_103 = arith.constant 0 : index
      %c0_104 = arith.constant 0 : index
      %143 = vector.load %arg8[%c0_102, %c0_103, %c0_104] : memref<1x4x128xf32, #tpu.memory_space<vmem>>, vector<1x4x128xf32>
      tpu.vector_store %arg8[%c0_102, %c0_103, %c0_104], %142 {strides = array<i32>} : memref<1x4x128xf32, #tpu.memory_space<vmem>>, vector<1x4x128xf32>,
    } else {
    }
    %c0 = arith.constant 0 : index
    %c0_1 = arith.constant 0 : index
    %c0_2 = arith.constant 0 : index
    %c0_3 = arith.constant 0 : index
    %3 = vector.load %arg2[%c0, %c0_1, %c0_2, %c0_3] : memref<1x4x32x128xf32, #tpu.memory_space<vmem>>, vector<1x4x32x128xf32>
    %c0_4 = arith.constant 0 : index
    %c0_5 = arith.constant 0 : index
    %c0_6 = arith.constant 0 : index
    %4 = vector.load %arg3[%c0_4, %c0_5, %c0_6] : memref<1x32x128xi8, #tpu.memory_space<vmem>>, vector<1x32x128xi8>
    %5 = arith.extsi %4 : vector<1x32x128xi8> to vector<1x32x128xi32>
    %cst = arith.constant dense<0xFF800000> : vector<1x32x128xf32>
    %6 = vector.multi_reduction <maximumf>, %3, %cst [1] : vector<1x4x32x128xf32> to vector<1x32x128xf32>
    %7 = vector.shape_cast %6 : vector<1x32x128xf32> to vector<1x1x32x128xf32>
    %8 = vector.broadcast %7 : vector<1x1x32x128xf32> to vector<1x4x32x128xf32>
    %9 = arith.subf %3, %8 : vector<1x4x32x128xf32>
    %10 = math.exp %9 : vector<1x4x32x128xf32>
    %cst_7 = arith.constant dense<0.000000e+00> : vector<1x32x128xf32>
    %11 = vector.multi_reduction <add>, %10, %cst_7 [1] : vector<1x4x32x128xf32> to vector<1x32x128xf32>
    %12 = vector.shape_cast %11 : vector<1x32x128xf32> to vector<1x1x32x128xf32>
    %13 = tpu.reciprocal %12 {approx = true} : vector<1x1x32x128xf32> -> vector<1x1x32x128xf32>
    %14 = arith.mulf %12, %13 : vector<1x1x32x128xf32>
    %cst_8 = arith.constant 2.000000e+00 : f32
    %15 = vector.broadcast %cst_8 : f32 to vector<1x1x32x128xf32>
    %16 = arith.subf %15, %14 : vector<1x1x32x128xf32>
    %17 = arith.mulf %13, %16 : vector<1x1x32x128xf32>
    %18 = vector.shape_cast %17 : vector<1x1x32x128xf32> to vector<1x32x128xf32>
    %19 = vector.extract_strided_slice %10 {offsets = [0, 0, 0, 0], sizes = [1, 1, 32, 128], strides = [1, 1, 1, 1]} : vector<1x4x32x128xf32> to vector<1x1x32x128xf32>
    %20 = vector.shape_cast %19 : vector<1x1x32x128xf32> to vector<1x32x128xf32>
    %21 = arith.mulf %20, %18 : vector<1x32x128xf32>
    %c0_i32_9 = arith.constant 0 : i32
    %22 = vector.broadcast %c0_i32_9 : i32 to vector<1x32x128xi32>
    %23 = arith.cmpi eq, %5, %22 : vector<1x32x128xi32>
    %24 = arith.extui %23 : vector<1x32x128xi1> to vector<1x32x128xi32>
    %25 = arith.sitofp %24 : vector<1x32x128xi32> to vector<1x32x128xf32>
    %c0_10 = arith.constant 0 : index
    %c0_11 = arith.constant 0 : index
    %c0_12 = arith.constant 0 : index
    %26 = vector.load %arg6[%c0_10, %c0_11, %c0_12] : memref<1x4x128xf32, #tpu.memory_space<vmem>>, vector<1x1x128xf32>
    %27 = vector.shape_cast %26 : vector<1x1x128xf32> to vector<1x128xf32>
    %28 = arith.mulf %21, %25 : vector<1x32x128xf32>
    %cst_13 = arith.constant dense<0.000000e+00> : vector<1x128xf32>
    %29 = vector.multi_reduction <add>, %28, %cst_13 [1] : vector<1x32x128xf32> to vector<1x128xf32>
    %30 = arith.addf %27, %29 : vector<1x128xf32>
    %c0_14 = arith.constant 0 : index
    %c0_15 = arith.constant 0 : index
    %c0_16 = arith.constant 0 : index
    %31 = vector.load %arg6[%c0_14, %c0_15, %c0_16] : memref<1x4x128xf32, #tpu.memory_space<vmem>>, vector<1x1x128xf32>
    %32 = vector.shape_cast %31 : vector<1x1x128xf32> to vector<1x128xf32>
    %33 = vector.shape_cast %30 : vector<1x128xf32> to vector<1x1x128xf32>
    tpu.vector_store %arg6[%c0_14, %c0_15, %c0_16], %33 {strides = array<i32>} : memref<1x4x128xf32, #tpu.memory_space<vmem>>, vector<1x1x128xf32>,
    %c0_17 = arith.constant 0 : index
    %c0_18 = arith.constant 0 : index
    %c0_19 = arith.constant 0 : index
    %34 = vector.load %arg7[%c0_17, %c0_18, %c0_19] : memref<1x4x128xf32, #tpu.memory_space<vmem>>, vector<1x1x128xf32>
    %35 = vector.shape_cast %34 : vector<1x1x128xf32> to vector<1x128xf32>
    %cst_20 = arith.constant dense<0.000000e+00> : vector<1x128xf32>
    %36 = vector.multi_reduction <add>, %21, %cst_20 [1] : vector<1x32x128xf32> to vector<1x128xf32>
    %37 = arith.addf %35, %36 : vector<1x128xf32>
    %c0_21 = arith.constant 0 : index
    %c0_22 = arith.constant 0 : index
    %c0_23 = arith.constant 0 : index
    %38 = vector.load %arg7[%c0_21, %c0_22, %c0_23] : memref<1x4x128xf32, #tpu.memory_space<vmem>>, vector<1x1x128xf32>
    %39 = vector.shape_cast %38 : vector<1x1x128xf32> to vector<1x128xf32>
    %40 = vector.shape_cast %37 : vector<1x128xf32> to vector<1x1x128xf32>
    tpu.vector_store %arg7[%c0_21, %c0_22, %c0_23], %40 {strides = array<i32>} : memref<1x4x128xf32, #tpu.memory_space<vmem>>, vector<1x1x128xf32>,
    %c0_24 = arith.constant 0 : index
    %c0_25 = arith.constant 0 : index
    %c0_26 = arith.constant 0 : index
    %41 = vector.load %arg8[%c0_24, %c0_25, %c0_26] : memref<1x4x128xf32, #tpu.memory_space<vmem>>, vector<1x1x128xf32>
    %42 = vector.shape_cast %41 : vector<1x1x128xf32> to vector<1x128xf32>
    %cst_27 = arith.constant dense<0.000000e+00> : vector<1x128xf32>
    %43 = vector.multi_reduction <add>, %25, %cst_27 [1] : vector<1x32x128xf32> to vector<1x128xf32>
    %44 = arith.addf %42, %43 : vector<1x128xf32>
    %c0_28 = arith.constant 0 : index
    %c0_29 = arith.constant 0 : index
    %c0_30 = arith.constant 0 : index
    %45 = vector.load %arg8[%c0_28, %c0_29, %c0_30] : memref<1x4x128xf32, #tpu.memory_space<vmem>>, vector<1x1x128xf32>
    %46 = vector.shape_cast %45 : vector<1x1x128xf32> to vector<1x128xf32>
    %47 = vector.shape_cast %44 : vector<1x128xf32> to vector<1x1x128xf32>
    tpu.vector_store %arg8[%c0_28, %c0_29, %c0_30], %47 {strides = array<i32>} : memref<1x4x128xf32, #tpu.memory_space<vmem>>, vector<1x1x128xf32>,
    %48 = vector.extract_strided_slice %10 {offsets = [0, 1, 0, 0], sizes = [1, 1, 32, 128], strides = [1, 1, 1, 1]} : vector<1x4x32x128xf32> to vector<1x1x32x128xf32>
    %49 = vector.shape_cast %48 : vector<1x1x32x128xf32> to vector<1x32x128xf32>
    %50 = arith.mulf %49, %18 : vector<1x32x128xf32>
    %c1_i32 = arith.constant 1 : i32
    %51 = vector.broadcast %c1_i32 : i32 to vector<1x32x128xi32>
    %52 = arith.cmpi eq, %5, %51 : vector<1x32x128xi32>
    %53 = arith.extui %52 : vector<1x32x128xi1> to vector<1x32x128xi32>
    %54 = arith.sitofp %53 : vector<1x32x128xi32> to vector<1x32x128xf32>
    %c0_31 = arith.constant 0 : index
    %c1 = arith.constant 1 : index
    %c0_32 = arith.constant 0 : index
    %55 = vector.load %arg6[%c0_31, %c1, %c0_32] : memref<1x4x128xf32, #tpu.memory_space<vmem>>, vector<1x1x128xf32>
    %56 = vector.shape_cast %55 : vector<1x1x128xf32> to vector<1x128xf32>
    %57 = arith.mulf %50, %54 : vector<1x32x128xf32>
    %cst_33 = arith.constant dense<0.000000e+00> : vector<1x128xf32>
    %58 = vector.multi_reduction <add>, %57, %cst_33 [1] : vector<1x32x128xf32> to vector<1x128xf32>
    %59 = arith.addf %56, %58 : vector<1x128xf32>
    %c0_34 = arith.constant 0 : index
    %c1_35 = arith.constant 1 : index
    %c0_36 = arith.constant 0 : index
    %60 = vector.load %arg6[%c0_34, %c1_35, %c0_36] : memref<1x4x128xf32, #tpu.memory_space<vmem>>, vector<1x1x128xf32>
    %61 = vector.shape_cast %60 : vector<1x1x128xf32> to vector<1x128xf32>
    %62 = vector.shape_cast %59 : vector<1x128xf32> to vector<1x1x128xf32>
    tpu.vector_store %arg6[%c0_34, %c1_35, %c0_36], %62 {strides = array<i32>} : memref<1x4x128xf32, #tpu.memory_space<vmem>>, vector<1x1x128xf32>,
    %c0_37 = arith.constant 0 : index
    %c1_38 = arith.constant 1 : index
    %c0_39 = arith.constant 0 : index
    %63 = vector.load %arg7[%c0_37, %c1_38, %c0_39] : memref<1x4x128xf32, #tpu.memory_space<vmem>>, vector<1x1x128xf32>
    %64 = vector.shape_cast %63 : vector<1x1x128xf32> to vector<1x128xf32>
    %cst_40 = arith.constant dense<0.000000e+00> : vector<1x128xf32>
    %65 = vector.multi_reduction <add>, %50, %cst_40 [1] : vector<1x32x128xf32> to vector<1x128xf32>
    %66 = arith.addf %64, %65 : vector<1x128xf32>
    %c0_41 = arith.constant 0 : index
    %c1_42 = arith.constant 1 : index
    %c0_43 = arith.constant 0 : index
    %67 = vector.load %arg7[%c0_41, %c1_42, %c0_43] : memref<1x4x128xf32, #tpu.memory_space<vmem>>, vector<1x1x128xf32>
    %68 = vector.shape_cast %67 : vector<1x1x128xf32> to vector<1x128xf32>
    %69 = vector.shape_cast %66 : vector<1x128xf32> to vector<1x1x128xf32>
    tpu.vector_store %arg7[%c0_41, %c1_42, %c0_43], %69 {strides = array<i32>} : memref<1x4x128xf32, #tpu.memory_space<vmem>>, vector<1x1x128xf32>,
    %c0_44 = arith.constant 0 : index
    %c1_45 = arith.constant 1 : index
    %c0_46 = arith.constant 0 : index
    %70 = vector.load %arg8[%c0_44, %c1_45, %c0_46] : memref<1x4x128xf32, #tpu.memory_space<vmem>>, vector<1x1x128xf32>
    %71 = vector.shape_cast %70 : vector<1x1x128xf32> to vector<1x128xf32>
    %cst_47 = arith.constant dense<0.000000e+00> : vector<1x128xf32>
    %72 = vector.multi_reduction <add>, %54, %cst_47 [1] : vector<1x32x128xf32> to vector<1x128xf32>
    %73 = arith.addf %71, %72 : vector<1x128xf32>
    %c0_48 = arith.constant 0 : index
    %c1_49 = arith.constant 1 : index
    %c0_50 = arith.constant 0 : index
    %74 = vector.load %arg8[%c0_48, %c1_49, %c0_50] : memref<1x4x128xf32, #tpu.memory_space<vmem>>, vector<1x1x128xf32>
    %75 = vector.shape_cast %74 : vector<1x1x128xf32> to vector<1x128xf32>
    %76 = vector.shape_cast %73 : vector<1x128xf32> to vector<1x1x128xf32>
    tpu.vector_store %arg8[%c0_48, %c1_49, %c0_50], %76 {strides = array<i32>} : memref<1x4x128xf32, #tpu.memory_space<vmem>>, vector<1x1x128xf32>,
    %77 = vector.extract_strided_slice %10 {offsets = [0, 2, 0, 0], sizes = [1, 1, 32, 128], strides = [1, 1, 1, 1]} : vector<1x4x32x128xf32> to vector<1x1x32x128xf32>
    %78 = vector.shape_cast %77 : vector<1x1x32x128xf32> to vector<1x32x128xf32>
    %79 = arith.mulf %78, %18 : vector<1x32x128xf32>
    %c2_i32 = arith.constant 2 : i32
    %80 = vector.broadcast %c2_i32 : i32 to vector<1x32x128xi32>
    %81 = arith.cmpi eq, %5, %80 : vector<1x32x128xi32>
    %82 = arith.extui %81 : vector<1x32x128xi1> to vector<1x32x128xi32>
    %83 = arith.sitofp %82 : vector<1x32x128xi32> to vector<1x32x128xf32>
    %c0_51 = arith.constant 0 : index
    %c2 = arith.constant 2 : index
    %c0_52 = arith.constant 0 : index
    %84 = vector.load %arg6[%c0_51, %c2, %c0_52] : memref<1x4x128xf32, #tpu.memory_space<vmem>>, vector<1x1x128xf32>
    %85 = vector.shape_cast %84 : vector<1x1x128xf32> to vector<1x128xf32>
    %86 = arith.mulf %79, %83 : vector<1x32x128xf32>
    %cst_53 = arith.constant dense<0.000000e+00> : vector<1x128xf32>
    %87 = vector.multi_reduction <add>, %86, %cst_53 [1] : vector<1x32x128xf32> to vector<1x128xf32>
    %88 = arith.addf %85, %87 : vector<1x128xf32>
    %c0_54 = arith.constant 0 : index
    %c2_55 = arith.constant 2 : index
    %c0_56 = arith.constant 0 : index
    %89 = vector.load %arg6[%c0_54, %c2_55, %c0_56] : memref<1x4x128xf32, #tpu.memory_space<vmem>>, vector<1x1x128xf32>
    %90 = vector.shape_cast %89 : vector<1x1x128xf32> to vector<1x128xf32>
    %91 = vector.shape_cast %88 : vector<1x128xf32> to vector<1x1x128xf32>
    tpu.vector_store %arg6[%c0_54, %c2_55, %c0_56], %91 {strides = array<i32>} : memref<1x4x128xf32, #tpu.memory_space<vmem>>, vector<1x1x128xf32>,
    %c0_57 = arith.constant 0 : index
    %c2_58 = arith.constant 2 : index
    %c0_59 = arith.constant 0 : index
    %92 = vector.load %arg7[%c0_57, %c2_58, %c0_59] : memref<1x4x128xf32, #tpu.memory_space<vmem>>, vector<1x1x128xf32>
    %93 = vector.shape_cast %92 : vector<1x1x128xf32> to vector<1x128xf32>
    %cst_60 = arith.constant dense<0.000000e+00> : vector<1x128xf32>
    %94 = vector.multi_reduction <add>, %79, %cst_60 [1] : vector<1x32x128xf32> to vector<1x128xf32>
    %95 = arith.addf %93, %94 : vector<1x128xf32>
    %c0_61 = arith.constant 0 : index
    %c2_62 = arith.constant 2 : index
    %c0_63 = arith.constant 0 : index
    %96 = vector.load %arg7[%c0_61, %c2_62, %c0_63] : memref<1x4x128xf32, #tpu.memory_space<vmem>>, vector<1x1x128xf32>
    %97 = vector.shape_cast %96 : vector<1x1x128xf32> to vector<1x128xf32>
    %98 = vector.shape_cast %95 : vector<1x128xf32> to vector<1x1x128xf32>
    tpu.vector_store %arg7[%c0_61, %c2_62, %c0_63], %98 {strides = array<i32>} : memref<1x4x128xf32, #tpu.memory_space<vmem>>, vector<1x1x128xf32>,
    %c0_64 = arith.constant 0 : index
    %c2_65 = arith.constant 2 : index
    %c0_66 = arith.constant 0 : index
    %99 = vector.load %arg8[%c0_64, %c2_65, %c0_66] : memref<1x4x128xf32, #tpu.memory_space<vmem>>, vector<1x1x128xf32>
    %100 = vector.shape_cast %99 : vector<1x1x128xf32> to vector<1x128xf32>
    %cst_67 = arith.constant dense<0.000000e+00> : vector<1x128xf32>
    %101 = vector.multi_reduction <add>, %83, %cst_67 [1] : vector<1x32x128xf32> to vector<1x128xf32>
    %102 = arith.addf %100, %101 : vector<1x128xf32>
    %c0_68 = arith.constant 0 : index
    %c2_69 = arith.constant 2 : index
    %c0_70 = arith.constant 0 : index
    %103 = vector.load %arg8[%c0_68, %c2_69, %c0_70] : memref<1x4x128xf32, #tpu.memory_space<vmem>>, vector<1x1x128xf32>
    %104 = vector.shape_cast %103 : vector<1x1x128xf32> to vector<1x128xf32>
    %105 = vector.shape_cast %102 : vector<1x128xf32> to vector<1x1x128xf32>
    tpu.vector_store %arg8[%c0_68, %c2_69, %c0_70], %105 {strides = array<i32>} : memref<1x4x128xf32, #tpu.memory_space<vmem>>, vector<1x1x128xf32>,
    %106 = vector.extract_strided_slice %10 {offsets = [0, 3, 0, 0], sizes = [1, 1, 32, 128], strides = [1, 1, 1, 1]} : vector<1x4x32x128xf32> to vector<1x1x32x128xf32>
    %107 = vector.shape_cast %106 : vector<1x1x32x128xf32> to vector<1x32x128xf32>
    %108 = arith.mulf %107, %18 : vector<1x32x128xf32>
    %c3_i32 = arith.constant 3 : i32
    %109 = vector.broadcast %c3_i32 : i32 to vector<1x32x128xi32>
    %110 = arith.cmpi eq, %5, %109 : vector<1x32x128xi32>
    %111 = arith.extui %110 : vector<1x32x128xi1> to vector<1x32x128xi32>
    %112 = arith.sitofp %111 : vector<1x32x128xi32> to vector<1x32x128xf32>
    %c0_71 = arith.constant 0 : index
    %c3 = arith.constant 3 : index
    %c0_72 = arith.constant 0 : index
    %113 = vector.load %arg6[%c0_71, %c3, %c0_72] : memref<1x4x128xf32, #tpu.memory_space<vmem>>, vector<1x1x128xf32>
    %114 = vector.shape_cast %113 : vector<1x1x128xf32> to vector<1x128xf32>
    %115 = arith.mulf %108, %112 : vector<1x32x128xf32>
    %cst_73 = arith.constant dense<0.000000e+00> : vector<1x128xf32>
    %116 = vector.multi_reduction <add>, %115, %cst_73 [1] : vector<1x32x128xf32> to vector<1x128xf32>
    %117 = arith.addf %114, %116 : vector<1x128xf32>
    %c0_74 = arith.constant 0 : index
    %c3_75 = arith.constant 3 : index
    %c0_76 = arith.constant 0 : index
    %118 = vector.load %arg6[%c0_74, %c3_75, %c0_76] : memref<1x4x128xf32, #tpu.memory_space<vmem>>, vector<1x1x128xf32>
    %119 = vector.shape_cast %118 : vector<1x1x128xf32> to vector<1x128xf32>
    %120 = vector.shape_cast %117 : vector<1x128xf32> to vector<1x1x128xf32>
    tpu.vector_store %arg6[%c0_74, %c3_75, %c0_76], %120 {strides = array<i32>} : memref<1x4x128xf32, #tpu.memory_space<vmem>>, vector<1x1x128xf32>,
    %c0_77 = arith.constant 0 : index
    %c3_78 = arith.constant 3 : index
    %c0_79 = arith.constant 0 : index
    %121 = vector.load %arg7[%c0_77, %c3_78, %c0_79] : memref<1x4x128xf32, #tpu.memory_space<vmem>>, vector<1x1x128xf32>
    %122 = vector.shape_cast %121 : vector<1x1x128xf32> to vector<1x128xf32>
    %cst_80 = arith.constant dense<0.000000e+00> : vector<1x128xf32>
    %123 = vector.multi_reduction <add>, %108, %cst_80 [1] : vector<1x32x128xf32> to vector<1x128xf32>
    %124 = arith.addf %122, %123 : vector<1x128xf32>
    %c0_81 = arith.constant 0 : index
    %c3_82 = arith.constant 3 : index
    %c0_83 = arith.constant 0 : index
    %125 = vector.load %arg7[%c0_81, %c3_82, %c0_83] : memref<1x4x128xf32, #tpu.memory_space<vmem>>, vector<1x1x128xf32>
    %126 = vector.shape_cast %125 : vector<1x1x128xf32> to vector<1x128xf32>
    %127 = vector.shape_cast %124 : vector<1x128xf32> to vector<1x1x128xf32>
    tpu.vector_store %arg7[%c0_81, %c3_82, %c0_83], %127 {strides = array<i32>} : memref<1x4x128xf32, #tpu.memory_space<vmem>>, vector<1x1x128xf32>,
    %c0_84 = arith.constant 0 : index
    %c3_85 = arith.constant 3 : index
    %c0_86 = arith.constant 0 : index
    %128 = vector.load %arg8[%c0_84, %c3_85, %c0_86] : memref<1x4x128xf32, #tpu.memory_space<vmem>>, vector<1x1x128xf32>
    %129 = vector.shape_cast %128 : vector<1x1x128xf32> to vector<1x128xf32>
    %cst_87 = arith.constant dense<0.000000e+00> : vector<1x128xf32>
    %130 = vector.multi_reduction <add>, %112, %cst_87 [1] : vector<1x32x128xf32> to vector<1x128xf32>
    %131 = arith.addf %129, %130 : vector<1x128xf32>
    %c0_88 = arith.constant 0 : index
    %c3_89 = arith.constant 3 : index
    %c0_90 = arith.constant 0 : index
    %132 = vector.load %arg8[%c0_88, %c3_89, %c0_90] : memref<1x4x128xf32, #tpu.memory_space<vmem>>, vector<1x1x128xf32>
    %133 = vector.shape_cast %132 : vector<1x1x128xf32> to vector<1x128xf32>
    %134 = vector.shape_cast %131 : vector<1x128xf32> to vector<1x1x128xf32>
    tpu.vector_store %arg8[%c0_88, %c3_89, %c0_90], %134 {strides = array<i32>} : memref<1x4x128xf32, #tpu.memory_space<vmem>>, vector<1x1x128xf32>,
    %c0_i32_91 = arith.constant 0 : i32
    %135 = arith.cmpi eq, %arg1, %c0_i32_91 : i32
    %136 = arith.extui %135 : i1 to i32
    %c0_i32_92 = arith.constant 0 : i32
    %137 = arith.cmpi ne, %136, %c0_i32_92 : i32
    scf.if %137 {
      %c0_93 = arith.constant 0 : index
      %c0_94 = arith.constant 0 : index
      %c0_95 = arith.constant 0 : index
      %138 = vector.load %arg6[%c0_93, %c0_94, %c0_95] : memref<1x4x128xf32, #tpu.memory_space<vmem>>, vector<1x4x128xf32>
      %cst_96 = arith.constant dense<0.000000e+00> : vector<1x4xf32>
      %139 = vector.multi_reduction <add>, %138, %cst_96 [2] : vector<1x4x128xf32> to vector<1x4xf32>
      %c0_97 = arith.constant 0 : index
      %c0_98 = arith.constant 0 : index
      %c0_99 = arith.constant 0 : index
      %140 = vector.load %arg7[%c0_97, %c0_98, %c0_99] : memref<1x4x128xf32, #tpu.memory_space<vmem>>, vector<1x4x128xf32>
      %cst_100 = arith.constant dense<0.000000e+00> : vector<1x4xf32>
      %141 = vector.multi_reduction <add>, %140, %cst_100 [2] : vector<1x4x128xf32> to vector<1x4xf32>
      %c0_101 = arith.constant 0 : index
      %c0_102 = arith.constant 0 : index
      %c0_103 = arith.constant 0 : index
      %142 = vector.load %arg8[%c0_101, %c0_102, %c0_103] : memref<1x4x128xf32, #tpu.memory_space<vmem>>, vector<1x4x128xf32>
      %cst_104 = arith.constant dense<0.000000e+00> : vector<1x4xf32>
      %143 = vector.multi_reduction <add>, %142, %cst_104 [2] : vector<1x4x128xf32> to vector<1x4xf32>
      %144 = vector.shape_cast %139 : vector<1x4xf32> to vector<1x1x4xf32>
      %c0_105 = arith.constant 0 : index
      %c0_106 = arith.constant 0 : index
      %c0_107 = arith.constant 0 : index
      %145 = vector.load %arg4[%c0_105, %c0_106, %c0_107] : memref<1x1x4xf32, #tpu.memory_space<vmem>>, vector<1x1x4xf32>
      tpu.vector_store %arg4[%c0_105, %c0_106, %c0_107], %144 {strides = array<i32>} : memref<1x1x4xf32, #tpu.memory_space<vmem>>, vector<1x1x4xf32>,
      %146 = arith.addf %141, %143 : vector<1x4xf32>
      %147 = arith.subf %146, %139 : vector<1x4xf32>
      %148 = vector.shape_cast %147 : vector<1x4xf32> to vector<1x1x4xf32>
      %c0_108 = arith.constant 0 : index
      %c0_109 = arith.constant 0 : index
      %c0_110 = arith.constant 0 : index
      %149 = vector.load %arg5[%c0_108, %c0_109, %c0_110] : memref<1x1x4xf32, #tpu.memory_space<vmem>>, vector<1x1x4xf32>
      tpu.vector_store %arg5[%c0_108, %c0_109, %c0_110], %148 {strides = array<i32>} : memref<1x1x4xf32, #tpu.memory_space<vmem>>, vector<1x1x4xf32>,
    } else {
    }
    return
  }
  func.func @transform_0(%arg0: i32, %arg1: i32) -> (i32, i32, i32, i32) {
    %c0_i32 = arith.constant 0 : i32
    %c0_i32_0 = arith.constant 0 : i32
    %c0_i32_1 = arith.constant 0 : i32
    return %arg0, %c0_i32, %arg1, %c0_i32_0 : i32, i32, i32, i32
  }
  func.func @transform_1(%arg0: i32, %arg1: i32) -> (i32, i32, i32) {
    %c0_i32 = arith.constant 0 : i32
    %c0_i32_0 = arith.constant 0 : i32
    return %arg0, %arg1, %c0_i32 : i32, i32, i32
  }
  func.func @transform_2(%arg0: i32, %arg1: i32) -> (i32, i32, i32) {
    %c0_i32 = arith.constant 0 : i32
    %c0_i32_0 = arith.constant 0 : i32
    %c0_i32_1 = arith.constant 0 : i32
    return %arg0, %c0_i32, %c0_i32_0 : i32, i32, i32
  }
  func.func @transform_3(%arg0: i32, %arg1: i32) -> (i32, i32, i32) {
    %c0_i32 = arith.constant 0 : i32
    %c0_i32_0 = arith.constant 0 : i32
    %c0_i32_1 = arith.constant 0 : i32
    return %arg0, %c0_i32, %c0_i32_0 : i32, i32, i32
  }
}

</mosaic_0001>

<bundles_post_ra>
// kernel: tpu_custom_call.1
= control target key start
LH: loop header
LB: loop body
LE: loop exit
PB: predicated region body
PF: predicated region fallthrough
CT: control target
= control target key end

     0   :  { %9 = vsyncpa [#allocation6], 0  ;;  %s1603_s0 = inlined_call_operand.hbm [shape: f32[2,4,32,128], index: 0, kind: input, shape index: {}]   ;;  %s1604_s1 = inlined_call_operand.hbm [shape: s8[2,32,128], index: 1, kind: input, shape index: {}]   ;;  %s1605_s2 = inlined_call_operand.hbm [shape: f32[2,1,4], index: 2, kind: output, shape index: {0}]   ;;  %s1606_s3 = inlined_call_operand.hbm [shape: f32[2,1,4], index: 3, kind: output, shape index: {1}]  }
   0x1   :  { %11 = vsyncpa [#allocation6 + $0x1], 0 }
   0x2   :  { %12 = vsyncpa [#allocation9], 0 }
   0x3   :  { %14 = vsyncpa [#allocation9 + $0x1], 0 }
   0x4   :  { %15 = vsyncpa [#allocation7], 0 }
   0x5   :  { %17 = vsyncpa [#allocation7 + $0x1], 0 }
   0x6   :  { %18 = vsyncpa [#allocation12], 0 }
   0x7   :  { %20 = vsyncpa [#allocation12 + $0x1], 0  ;;  %s1144_s12 = smov 0   ;;  %s1146_s13 = smov 0  }
   0x8   :  { %s1148_s14 = smov 0   ;;  %s1150_s15 = smov 0  }
   0x9   :  { %s1152_s16 = smov 0   ;;  %s1154_s17 = smov 0  }
   0xa LB: > { %s789_s18 = sadd.s32 4294967295, %s1115_s17   ;;  %s790_s19 = sadd.s32 4294967294, %s1115_s17   ;;  %s1115_s17 = sphi %s1154_s17, %s26_s17   ;;  %s1111_s16 = sphi %s1152_s16, %s1625_s16   ;;  %s1107_s15 = sphi %s1150_s15, %s1624_s15   ;;  %s1103_s14 = sphi %s1148_s14, %s1623_s14   ;;  %s1099_s13 = sphi %s1146_s13, %s1622_s13   ;;  %s1095_s12 = sphi %s1144_s12, %s1621_s12  }
   0xb   : > { %s38_s20 = sadd.s32 1, %s1111_s16  ;;  %s47_s21 = sadd.s32 1, %s1103_s14 }
   0xc   : > { %p40_p0 = scmp.ge.s32.totalorder %s38_s20, 2  ;;  %p54_p1 = scmp.ne.s32.totalorder %s1103_s14, %s1099_s13 }
   0xd   : > { %p55_p2 = scmp.eq.s32.totalorder %s1115_s17, 0  ;;  %p60_p3 = scmp.ne.s32.totalorder %s1099_s13, %s1095_s12 }
   0xe   : > { %s1627_s20 = smov (%p40_p0, %s38_s20), 0  ;;  %p61_p5 = scmp.eq.s32.totalorder %s789_s18, 0 }
   0xf   : > { %p1185_p4 = por %p55_p2, %p54_p1  ;;  %s42_s23 = ssub.s32 %s1111_s16, %s1627_s20 }
  0x10   : > { %p112_p6 = scmp.eq.s32.totalorder %s789_s18, 1  ;;  %p45_p7 = scmp.eq.s32.totalorder %s42_s23, 0 }
  0x11   : > { %p1191_p8 = por %p61_p5, %p60_p3  ;;  %p118_p10 = scmp.eq.s32.totalorder %s790_s19, 1 }
  0x12   : > { %p1195_p9 = por %p112_p6, %p54_p1  ;;  %p844_p13 = scmp.lt.s32.totalorder %s1115_s17, 2 }
  0x13   : > { %s1610_s24 = scalar_select %p1191_p8, 1, 0 }
  0x14   : > { %s1611_s25 = scalar_select %p1195_p9, 1, 0 }
  0x15   : > { %s1200_s26 = scalar_select %p45_p7, %s1103_s14, %s47_s21  }
  0x16   : > { %p1202_p11 = por %p118_p10, %p60_p3  ;;  %s1209_s28 = sand.u32 1, %s1103_s14  }
  0x17   : > { %s793_s29 = sshll.u32 %s1209_s28, 7  ;;  %s821_s30 = sshll.u32 %s1111_s16, 11 }
  0x18   : > { %s1612_s27 = scalar_select %p1202_p11, 1, 0 }
  0x19   : > { %s1216_s6 = scalar_lea.hbm %s1603_s0, %s821_s30  ;;  %s168_s7 = scalar_lea.vmem [#allocation5], %s793_s29 }
  0x1a   : > { %s177_s8 = sshll.u32 %s168_s7, 4  ;;  %p1222_p0 = pnand %p844_p13, %p1185_p4  ;;  %s1218_s8 = int_to_ptr.vmem [resolvable:$true] %s177_s8 }
  0x1b   : > { %s165_s10 = scalar_lea.sflag [#allocation6], %s1209_s28  ;;  %s937_s11 = scalar_lea.hbm %s1216_s6, 2048 }
  0x1c   : > { %p938_p2 = scmp.ne.s32.totalorder %s1216_s6, %s937_s11  ;;  %p939_p3 = pneg %p1222_p0 }
  0x1d   : > { %s942_s21 = scalar_lea.hbm %s1603_s0, 4096  ;;  %p943_p4 = scmp.lt.u32.totalorder %s1216_s6, %s1603_s0 }
  0x1e   : > { %p940_p5 = pnand %p939_p3, %p938_p2  ;;  %p944_p7 = scmp.lt.u32.totalorder %s942_s21, %s937_s11 }
  0x1f   : > { %p946_p13 = scmp.lt.u32.totalorder %s937_s11, %s1216_s6 }
  0x20   : > { %p941_p6 = pneg %p940_p5  ;;  %p945_p10 = por %p944_p7, %p943_p4 }
  0x22   : > { %p947_p12 = por %p946_p13, %p945_p10 }
  0x24   : > { %p948_p1 = pnand %p947_p12, %p941_p6 }
  0x26   : > { %951 = shalt.err (!%p948_p1)
}
  0x27   : > { %s952_s29 = scalar_lea.vmem %s1218_s8, 2048  ;;  %s1117_s30 = smov [#allocation5]  }
  0x28   : > { %p953_p2 = scmp.ne.s32.totalorder %s1218_s8, %s952_s29  ;;  %s957_s4 = sshll.u32 %s1117_s30, 4  ;;  %s958_s4 = int_to_ptr.vmem [resolvable:$false] %s957_s4 }
  0x29   : > { %s959_s5 = scalar_lea.vmem %s958_s4, 4096  ;;  %p960_p9 = scmp.lt.s32.totalorder %s1218_s8, %s958_s4 }
  0x2a   : > { %p955_p5 = pnand %p953_p2, %p939_p3  ;;  %p961_p4 = scmp.lt.s32.totalorder %s959_s5, %s952_s29 }
  0x2c   : > { %p956_p11 = pneg %p955_p5  ;;  %p962_p7 = por %p961_p4, %p960_p9 }
  0x2e   : > { %p963_p10 = pnand %p962_p7, %p956_p11 }
  0x30   : > { %966 = shalt.err (!%p963_p10)
}
  0x31   : > { %s1118_s7 = smov 128   ;;  %s1119_s11 = smov 8  }
  0x32   : > { %833 = dma.hbm_to_vmem [thread:$0]  (!%p1222_p0), %s1216_s6, 2048, %s1218_s8, %s165_s10, %s1118_s7, %s1118_s7, %s1119_s11  }
  0x33   : > { %p204_p12 = scmp.lt.s32.totalorder %s1115_s17, 3  ;;  %s796_s18 = sshll.u32 %s1209_s28, 3 }
  0x34   : > { %s797_s19 = sshll.u32 %s1111_s16, 7  ;;  %p1614_p9 = scmp.ge.s32.totalorder %s1115_s17, 1 }
  0x35   : > { %s1267_s29 = scalar_lea.hbm %s1604_s1, %s797_s19  ;;  %s191_s30 = scalar_lea.vmem [#allocation8], %s796_s18 }
  0x36   : > { %p1260_p11 = pnand %p1614_p9, %p204_p12  ;;  %s199_s4 = sshll.u32 %s191_s30, 4  ;;  %s200_s4 = int_to_ptr.vmem [resolvable:$true] %s199_s4 }
  0x37   : > { %s188_s6 = scalar_lea.sflag [#allocation9], %s1209_s28  ;;  %s967_s8 = scalar_lea.hbm %s1267_s29, 128 }
  0x38   : > { %s1615_s21 = scalar_select %p1260_p11, 1, 0 }
  0x39   : > { %p968_p1 = scmp.ne.s32.totalorder %s1267_s29, %s967_s8  ;;  %s972_s7 = scalar_lea.hbm %s1604_s1, 256 }
  0x3a   : > { %p973_p2 = scmp.lt.u32.totalorder %s1267_s29, %s1604_s1  ;;  %p974_p5 = scmp.lt.u32.totalorder %s972_s7, %s967_s8 }
  0x3b   : > { %p970_p6 = pnand %p968_p1, %p939_p3  ;;  %p976_p7 = scmp.lt.u32.totalorder %s967_s8, %s1267_s29 }
  0x3c   : > { %p975_p4 = por %p974_p5, %p973_p2 }
  0x3d   : > { %p971_p13 = pneg %p970_p6 }
  0x3e   : > { %p977_p10 = por %p976_p7, %p975_p4 }
  0x40   : > { %p978_p12 = pnand %p977_p10, %p971_p13 }
  0x42   : > { %981 = shalt.err (!%p978_p12)
}
  0x43   : > { %s982_s28 = scalar_lea.vmem %s200_s4, 128  ;;  %s1120_s18 = smov [#allocation8]  }
  0x44   : > { %p983_p9 = scmp.ne.s32.totalorder %s200_s4, %s982_s28  ;;  %s987_s22 = sshll.u32 %s1120_s18, 4  ;;  %s988_s22 = int_to_ptr.vmem [resolvable:$false] %s987_s22 }
  0x45   : > { %s989_s23 = scalar_lea.vmem %s988_s22, 256  ;;  %p990_p8 = scmp.lt.s32.totalorder %s200_s4, %s988_s22 }
  0x46   : > { %p985_p1 = pnand %p983_p9, %p939_p3  ;;  %p991_p11 = scmp.lt.s32.totalorder %s989_s23, %s982_s28 }
  0x48   : > { %p986_p6 = pneg %p985_p1  ;;  %p992_p2 = por %p991_p11, %p990_p8 }
  0x4a   : > { %p993_p5 = pnand %p992_p2, %p986_p6 }
  0x4c   : > { %996 = shalt.err (!%p993_p5)
}
  0x4d   : > { %836 = dma.hbm_to_vmem [thread:$0]  (!%p1222_p0), %s1267_s29, 128, %s200_s4, %s188_s6  }
  0x4e   : > { %p1616_p13 = scmp.ne.s32.totalorder %s1615_s21, 0 }
  0x4f   : > { %s1292_s30 = sand.u32 (!%p1616_p13), 1, %s1099_s13   ;;  %p1617_p8 = scmp.ne.s32.totalorder (!%p1616_p13), %s1610_s24, 0 }
  0x50   : > { %208 = sbr.rel (%p1616_p13) target bundleno = 381 (0x17d), region = 28  ;;  %s799_s8 = sshll.u32 (!%p1616_p13), %s1292_s30, 7 }
  0x51   : > { %s211_s10 = scalar_lea.sflag (!%p1616_p13), [#allocation6], %s1292_s30  ;;  %s1296_s5 = scalar_lea.vmem (!%p1616_p13), [#allocation5], %s799_s8 }
  0x57   : > { %1078 = dma.done.wait (%p1617_p8), %s211_s10, 2048  }
  0x58   : > { %1080 = vsyncadd (%p1617_p8), %s211_s10, 4294965248  ;;  %s800_s9 = sshll.u32 %s1292_s30, 3  ;;  %s220_s21 = scalar_lea.sflag [#allocation9], %s1292_s30 }
  0x59   : > { %s1304_s29 = scalar_lea.vmem [#allocation8], %s800_s9 }
  0x5a   : > { %1082 = dma.done.wait (%p1617_p8), %s220_s21, 128  }
  0x5b   : > { %1084 = vsyncadd (%p1617_p8), %s220_s21, 4294967168  ;;  %v1121_v0 = vmov 0.0   ;;  %v262_v1 = vld [vmem:[%s1296_s5] sm:$0xff]  ;;  %v263_v2 = vld [vmem:[%s1296_s5 + $0x8] sm:$0xff]  ;;  %s817_s24 = sshll.u32 %s1107_s15, 4  ;;  %s247_s4 = scalar_lea.vmem [#allocation10], %s1292_s30 }
  0x5c   : > { %260 = vst [vmem:[#allocation3] sm:$0xf] %v1121_v0  ;;  %259 = vst [vmem:[#allocation2] sm:$0xf] %v1121_v0  ;;  %v264_v3 = vld [vmem:[%s1296_s5 + $0x10] sm:$0xff]  ;;  %v265_v4 = vld [vmem:[%s1296_s5 + $0x18] sm:$0xff]  ;;  %s1521_s18 = scalar_lea.hbm %s1605_s2, %s817_s24  ;;  %s1529_s23 = scalar_lea.hbm %s1606_s3, %s817_s24 }
  0x5d   : > { %261 = vst [vmem:[#allocation4] sm:$0xf] %v1121_v0  ;;  %v266_v5 = vld [vmem:[%s1296_s5 + $0x20] sm:$0xff]  ;;  %v267_v6 = vld [vmem:[%s1296_s5 + $0x28] sm:$0xff]  ;;  %v268_v7 = vld [vmem:[%s1296_s5 + $0x30] sm:$0xff]  ;;  %s647_s6 = sshll.u32 %s247_s4, 4  ;;  %s1523_s6 = int_to_ptr.vmem [resolvable:$true] %s647_s6 }
  0x5e   : > { %v269_v8 = vld [vmem:[%s1296_s5 + $0x38] sm:$0xff]  ;;  %v270_v9 = vld [vmem:[%s1296_s5 + $0x40] sm:$0xff]  ;;  %v283_v10 = vmax.f32 %v262_v1, %v266_v5  ;;  %v286_v11 = vmax.f32 %v263_v2, %v267_v6  ;;  %v271_v12 = vld [vmem:[%s1296_s5 + $0x48] sm:$0xff]  ;;  %v289_v15 = vmax.f32 %v264_v3, %v268_v7  ;;  %s253_s7 = scalar_lea.vmem [#allocation11], %s1292_s30  ;;  %s631_s8 = scalar_lea.sflag [#allocation7], %s1292_s30 }
  0x5f   : > { %v272_v13 = vld [vmem:[%s1296_s5 + $0x50] sm:$0xff]  ;;  %v273_v14 = vld [vmem:[%s1296_s5 + $0x58] sm:$0xff]  ;;  %v292_v16 = vmax.f32 %v265_v4, %v269_v8  ;;  %v274_v17 = vld [vmem:[%s1296_s5 + $0x60] sm:$0xff]  ;;  %s660_s11 = sshll.u32 %s253_s7, 4  ;;  %s997_s10 = scalar_lea.vmem %s1523_s6, 16  ;;  %s1531_s11 = int_to_ptr.vmem [resolvable:$true] %s660_s11 }
  0x60   : > { %v275_v18 = vld [vmem:[%s1296_s5 + $0x68] sm:$0xff]  ;;  %v276_v19 = vld [vmem:[%s1296_s5 + $0x70] sm:$0xff]  ;;  %v284_v20 = vmax.f32 %v283_v10, %v270_v9  ;;  %v287_v21 = vmax.f32 %v286_v11, %v271_v12  ;;  %v277_v22 = vld [vmem:[%s1296_s5 + $0x78] sm:$0xff]  ;;  %v290_v23 = vmax.f32 %v289_v15, %v272_v13  ;;  %p998_p0 = scmp.ne.s32.totalorder %s1523_s6, %s997_s10  ;;  %p1618_p3 = scmp.ne.s32.totalorder %s1611_s25, 0 }
  0x61   : > { %v293_v24 = vmax.f32 %v292_v16, %v273_v14  ;;  %v278_v27 = vld [vmem:[%s1304_s29] sm:$0xff]  ;;  %s1122_s5 = smov [#allocation10]  }
  0x62   : > { %v285_v25 = vmax.f32 %v284_v20, %v274_v17  ;;  %v288_v26 = vmax.f32 %v287_v21, %v275_v18  ;;  %v291_v28 = vmax.f32 %v290_v23, %v276_v19  ;;  %v1330_v30 = vunpack.c.0.s8 %v278_v27  ;;  %p999_p11 = pnand %p998_p0, %p1618_p3  ;;  %s1001_s9 = sshll.u32 %s1122_s5, 4  ;;  %s1002_s9 = int_to_ptr.vmem [resolvable:$false] %s1001_s9 }
  0x63   : > { %v294_v29 = vmax.f32 %v293_v24, %v277_v22  ;;  %v1332_v31 = vunpack.c.1.s8 %v278_v27  ;;  %v1334_v51 = vunpack.c.2.s8 %v278_v27  ;;  %v1336_v55 = vunpack.c.3.s8 %v278_v27  ;;  %s1003_s21 = scalar_lea.vmem %s1002_s9, 32  ;;  %p1004_p7 = scmp.lt.s32.totalorder %s1523_s6, %s1002_s9 }
  0x64   : > { %v295_v32 = vsub.f32 %v262_v1, %v285_v25  ;;  %v296_v33 = vsub.f32 %v263_v2, %v288_v26  ;;  %v299_v34 = vsub.f32 %v266_v5, %v285_v25  ;;  %v300_v35 = vsub.f32 %v267_v6, %v288_v26  ;;  %p1000_p4 = pneg %p999_p11  ;;  %p1005_p10 = scmp.lt.s32.totalorder %s1003_s21, %s997_s10 }
  0x65   : > { %v297_v36 = vsub.f32 %v264_v3, %v291_v28  ;;  %v298_v37 = vsub.f32 %v265_v4, %v294_v29  ;;  %v301_v38 = vsub.f32 %v268_v7, %v291_v28  ;;  %v302_v39 = vsub.f32 %v269_v8, %v294_v29 }
  0x66   : > { %v303_v40 = vsub.f32 %v270_v9, %v285_v25  ;;  %v304_v41 = vsub.f32 %v271_v12, %v288_v26  ;;  %v305_v42 = vsub.f32 %v272_v13, %v291_v28  ;;  %v306_v43 = vsub.f32 %v273_v14, %v294_v29  ;;  %p1006_p12 = por %p1005_p10, %p1004_p7 }
  0x67   : > { %v307_v44 = vsub.f32 %v274_v17, %v285_v25  ;;  %v308_v45 = vsub.f32 %v275_v18, %v288_v26  ;;  %v309_v46 = vsub.f32 %v276_v19, %v291_v28  ;;  %v310_v47 = vsub.f32 %v277_v22, %v294_v29 }
  0x68   : > { %v311_v48 = vmul.f32 1.442695, %v295_v32  ;;  %v313_v49 = vmul.f32 1.442695, %v296_v33  ;;  %v315_v50 = vmul.f32 1.442695, %v297_v36  ;;  %p1007_p9 = pnand %p1006_p12, %p1000_p4 }
  0x69   : > { %v317_v52 = vmul.f32 1.442695, %v298_v37  ;;  %v319_v53 = vmul.f32 1.442695, %v299_v34  ;;  %v321_v54 = vmul.f32 1.442695, %v300_v35 }
  0x6a   : > { %897 = vpow2.f32 %v311_v48  ;;  %v323_v56 = vmul.f32 1.442695, %v301_v38  ;;  %v325_v57 = vmul.f32 1.442695, %v302_v39  ;;  %v327_v58 = vmul.f32 1.442695, %v303_v40 }
  0x6b   : > { %899 = vpow2.f32 %v313_v49  ;;  %v329_v59 = vmul.f32 1.442695, %v304_v41  ;;  %v331_v60 = vmul.f32 1.442695, %v305_v42  ;;  %v333_v61 = vmul.f32 1.442695, %v306_v43 }
  0x6c   : > { %901 = vpow2.f32 %v315_v50  ;;  %v335_v62 = vmul.f32 1.442695, %v307_v44  ;;  %v337_v63 = vmul.f32 1.442695, %v308_v45  ;;  %v339_v1 = vmul.f32 1.442695, %v309_v46 }
  0x6d   : > { %903 = vpow2.f32 %v317_v52  ;;  %v341_v2 = vmul.f32 1.442695, %v310_v47  ;;  %vm375_vm0 = vcmp.eq.s32.totalorder %v1330_v30, 0  ;;  %vm376_vm1 = vcmp.eq.s32.totalorder %v1332_v31, 0 }
  0x6e   : > { %905 = vpow2.f32 %v319_v53  ;;  %vm377_vm2 = vcmp.eq.s32.totalorder %v1334_v51, 0  ;;  %vm378_vm3 = vcmp.eq.s32.totalorder %v1336_v55, 0  ;;  %v1343_v3 = vsel %vm375_vm0, 1.0, %v1121_v0 }
  0x6f   : > { %907 = vpow2.f32 %v321_v54  ;;  %v1346_v4 = vsel %vm376_vm1, 1.0, %v1121_v0  ;;  %v1349_v5 = vsel %vm377_vm2, 1.0, %v1121_v0  ;;  %v1352_v6 = vsel %vm378_vm3, 1.0, %v1121_v0 }
  0x70   : > { %909 = vpow2.f32 %v323_v56  ;;  %v416_v7 = vadd.f32 %v1346_v4, %v1343_v3  ;;  %vm431_vm4 = vcmp.eq.s32.totalorder %v1330_v30, 1  ;;  %vm432_vm5 = vcmp.eq.s32.totalorder %v1332_v31, 1 }
  0x71   : > { %911 = vpow2.f32 %v325_v57  ;;  %vm433_vm6 = vcmp.eq.s32.totalorder %v1334_v51, 1  ;;  %vm434_vm7 = vcmp.eq.s32.totalorder %v1336_v55, 1  ;;  %v1361_v8 = vsel %vm431_vm4, 1.0, %v1121_v0  ;;  %v415_v57 = vld [vmem:[#allocation4] sm:$0x1] }
  0x72   : > { %913 = vpow2.f32 %v327_v58  ;;  %v417_v9 = vadd.f32 %v1349_v5, %v416_v7  ;;  %v1365_v10 = vsel %vm432_vm5, 1.0, %v1121_v0  ;;  %v1368_v11 = vsel %vm433_vm6, 1.0, %v1121_v0 }
  0x73   : > { %915 = vpow2.f32 %v329_v59  ;;  %v1371_v12 = vsel %vm434_vm7, 1.0, %v1121_v0  ;;  %v472_v13 = vadd.f32 %v1365_v10, %v1361_v8  ;;  %vm487_vm8 = vcmp.eq.s32.totalorder %v1330_v30, 2 }
  0x74   : > { %v1376_v14 = vpop.eup %897  ;;  %917 = vpow2.f32 %v331_v60  ;;  %v418_v15 = vadd.f32 %v1352_v6, %v417_v9  ;;  %vm488_vm9 = vcmp.eq.s32.totalorder %v1332_v31, 2  ;;  %vm489_vm10 = vcmp.eq.s32.totalorder %v1334_v51, 2 }
  0x75   : > { %v1381_v16 = vpop.eup %899  ;;  %919 = vpow2.f32 %v333_v61  ;;  %v473_v17 = vadd.f32 %v1368_v11, %v472_v13  ;;  %vm490_vm11 = vcmp.eq.s32.totalorder %v1336_v55, 2  ;;  %v1386_v18 = vsel %vm487_vm8, 1.0, %v1121_v0 }
  0x76   : > { %v1388_v19 = vpop.eup %901  ;;  %921 = vpow2.f32 %v335_v62  ;;  %v419_v20 = vrot.slane %v418_v15, 4  ;;  %v1391_v21 = vsel %vm488_vm9, 1.0, %v1121_v0  ;;  %v1394_v22 = vsel %vm489_vm10, 1.0, %v1121_v0 }
  0x77   : > { %v1396_v23 = vpop.eup %903  ;;  %923 = vpow2.f32 %v337_v63  ;;  %v474_v24 = vadd.f32 %v1371_v12, %v473_v17  ;;  %v1400_v25 = vsel %vm490_vm11, 1.0, %v1121_v0  ;;  %v528_v26 = vadd.f32 %v1391_v21, %v1386_v18 }
  0x78   : > { %v1404_v27 = vpop.eup %905  ;;  %925 = vpow2.f32 %v339_v1  ;;  %v420_v28 = vadd.f32 %v419_v20, %v418_v15  ;;  %vm543_vm12 = vcmp.eq.s32.totalorder %v1330_v30, 3  ;;  %vm544_vm13 = vcmp.eq.s32.totalorder %v1332_v31, 3 }
  0x79   : > { %v1408_v29 = vpop.eup %907  ;;  %927 = vpow2.f32 %v341_v2  ;;  %v343_v32 = vadd.f32 %v1404_v27, %v1376_v14  ;;  %v475_v33 = vrot.slane %v474_v24, 4  ;;  %v529_v34 = vadd.f32 %v1394_v22, %v528_v26 }
  0x7a   : > { %v1413_v35 = vpop.eup %909  ;;  %v346_v36 = vadd.f32 %v1408_v29, %v1381_v16  ;;  %v421_v37 = vrot.slane %v420_v28, 2  ;;  %vm545_vm14 = vcmp.eq.s32.totalorder %v1334_v51, 3  ;;  %v1424_v41 = vsel %vm543_vm12, 1.0, %v1121_v0 }
  0x7b   : > { %v1418_v30 = vpop.eup %911  ;;  %v349_v38 = vadd.f32 %v1413_v35, %v1388_v19  ;;  %v476_v39 = vadd.f32 %v475_v33, %v474_v24  ;;  %v530_v40 = vadd.f32 %v1400_v25, %v529_v34  ;;  %vm546_vm15 = vcmp.eq.s32.totalorder %v1336_v55, 3 }
  0x7c   : > { %v1426_v42 = vpop.eup %913  ;;  %v352_v43 = vadd.f32 %v1418_v30, %v1396_v23  ;;  %v422_v44 = vadd.f32 %v421_v37, %v420_v28  ;;  %v1434_v45 = vsel %vm544_vm13, 1.0, %v1121_v0  ;;  %v1440_v50 = vsel %vm545_vm14, 1.0, %v1121_v0 }
  0x7d   : > { %v1436_v46 = vpop.eup %915  ;;  %v344_v47 = vadd.f32 %v1426_v42, %v343_v32  ;;  %v477_v48 = vrot.slane %v476_v39, 2  ;;  %v531_v49 = vrot.slane %v530_v40, 4  ;;  %v584_v54 = vadd.f32 %v1434_v45, %v1424_v41 }
  0x7e   : > { %v1442_v51 = vpop.eup %917  ;;  %v347_v52 = vadd.f32 %v1436_v46, %v346_v36  ;;  %v423_v53 = vrot.slane %v422_v44, 1  ;;  %v1453_v60 = vsel %vm546_vm15, 1.0, %v1121_v0  ;;  %v471_v0 = vld [vmem:[#allocation4 + $0x1] sm:$0x1]  ;;  %vm599_vm0 = vcmask 1043456  }
  0x7f   : > { %v1447_v31 = vpop.eup %919  ;;  %v350_v56 = vadd.f32 %v1442_v51, %v349_v38  ;;  %v478_v58 = vadd.f32 %v477_v48, %v476_v39  ;;  %v532_v59 = vadd.f32 %v531_v49, %v530_v40  ;;  %v585_v1 = vadd.f32 %v1440_v50, %v584_v54  ;;  %v527_v38 = vld [vmem:[#allocation4 + $0x2] sm:$0x1] }
  0x80   : > { %v1455_v61 = vpop.eup %921  ;;  %v353_v62 = vadd.f32 %v1447_v31, %v352_v43  ;;  %v424_v63 = vadd.f32 %v423_v53, %v422_v44  ;;  %vm619_vm1 = vcmask 24576  }
  0x81   : > { %v1459_v2 = vpop.eup %923  ;;  %v345_v7 = vadd.f32 %v1455_v61, %v344_v47  ;;  %v479_v9 = vrot.slane %v478_v58, 1  ;;  %v533_v13 = vrot.slane %v532_v59, 2  ;;  %v586_v20 = vadd.f32 %v1453_v60, %v585_v1 }
  0x82   : > { %v1462_v15 = vpop.eup %925  ;;  %v348_v17 = vadd.f32 %v1459_v2, %v347_v52  ;;  %v425_v55 = vadd.f32 %v424_v63, %v415_v57  ;;  %v583_v52 = vld [vmem:[#allocation4 + $0x3] sm:$0x1] }
  0x83   : > { %v1466_v24 = vpop.eup %927  ;;  %v351_v26 = vadd.f32 %v1462_v15, %v350_v56  ;;  %929 = vrcp.f32 %v345_v7  ;;  %v480_v28 = vadd.f32 %v479_v9, %v478_v58  ;;  %v534_v32 = vadd.f32 %v533_v13, %v532_v59 }
  0x84   : > { %v354_v33 = vadd.f32 %v1466_v24, %v353_v62  ;;  %931 = vrcp.f32 %v348_v17  ;;  %426 = vst [vmem:[#allocation4] sm:$0x1] %v425_v55  ;;  %v587_v34 = vrot.slane %v586_v20, 4 }
  0x85   : > { %933 = vrcp.f32 %v351_v26  ;;  %v481_v36 = vadd.f32 %v480_v28, %v471_v0  ;;  %v535_v37 = vrot.slane %v534_v32, 1 }
  0x86   : > { %935 = vrcp.f32 %v354_v33  ;;  %v588_v39 = vadd.f32 %v587_v34, %v586_v20 }
  0x87   : > { %482 = vst [vmem:[#allocation4 + $0x1] sm:$0x1] %v481_v36  ;;  %v536_v40 = vadd.f32 %v535_v37, %v534_v32 }
  0x88   : > { %v589_v43 = vrot.slane %v588_v39, 2 }
  0x89   : > { %v537_v44 = vadd.f32 %v536_v40, %v527_v38 }
  0x8a   : > { %v590_v47 = vadd.f32 %v589_v43, %v588_v39 }
  0x8b   : > { %538 = vst [vmem:[#allocation4 + $0x2] sm:$0x1] %v537_v44 }
  0x8c   : > { %v591_v48 = vrot.slane %v590_v47, 1 }
  0x8d   : > { %v930_v49 = vpop.eup %929 }
  0x8e   : > { %v932_v53 = vpop.eup %931  ;;  %v359_v54 = vmul.f32 %v930_v49, %v345_v7  ;;  %v592_v56 = vadd.f32 %v591_v48, %v590_v47 }
  0x8f   : > { %v934_v57 = vpop.eup %933  ;;  %v360_v58 = vmul.f32 %v932_v53, %v348_v17 }
  0x90   : > { %v936_v59 = vpop.eup %935  ;;  %v361_v62 = vmul.f32 %v934_v57, %v351_v26  ;;  %v363_v63 = vsub.f32 2.0, %v359_v54  ;;  %v593_v1 = vadd.f32 %v592_v56, %v583_v52 }
  0x91   : > { %v362_v9 = vmul.f32 %v936_v59, %v354_v33  ;;  %v364_v13 = vsub.f32 2.0, %v360_v58 }
  0x92   : > { %v365_v55 = vsub.f32 2.0, %v361_v62  ;;  %v367_v0 = vmul.f32 %v930_v49, %v363_v63  ;;  %594 = vst [vmem:[#allocation4 + $0x3] sm:$0x1] %v593_v1 }
  0x93   : > { %v366_v20 = vsub.f32 2.0, %v362_v9  ;;  %v368_v28 = vmul.f32 %v932_v53, %v364_v13 }
  0x94   : > { %v369_v32 = vmul.f32 %v934_v57, %v365_v55  ;;  %v371_v34 = vmul.f32 %v1376_v14, %v367_v0  ;;  %v427_v36 = vmul.f32 %v1404_v27, %v367_v0  ;;  %v483_v7 = vmul.f32 %v1426_v42, %v367_v0 }
  0x95   : > { %v370_v37 = vmul.f32 %v936_v59, %v366_v20  ;;  %v372_v17 = vmul.f32 %v1381_v16, %v368_v28  ;;  %v428_v26 = vmul.f32 %v1408_v29, %v368_v28  ;;  %v484_v33 = vmul.f32 %v1436_v46, %v368_v28 }
  0x96   : > { %v373_v38 = vmul.f32 %v1388_v19, %v369_v32  ;;  %v429_v39 = vmul.f32 %v1413_v35, %v369_v32  ;;  %v485_v40 = vmul.f32 %v1442_v51, %v369_v32  ;;  %v539_v43 = vmul.f32 %v1455_v61, %v367_v0 }
  0x97   : > { %v374_v14 = vmul.f32 %v1396_v23, %v370_v37  ;;  %v404_v27 = vadd.f32 %v372_v17, %v371_v34  ;;  %v430_v42 = vmul.f32 %v1418_v30, %v370_v37  ;;  %v460_v44 = vadd.f32 %v428_v26, %v427_v36 }
  0x98   : > { %v486_v16 = vmul.f32 %v1447_v31, %v370_v37  ;;  %v516_v47 = vadd.f32 %v484_v33, %v483_v7  ;;  %v540_v29 = vmul.f32 %v1459_v2, %v368_v28  ;;  %v1485_v46 = vmul.f32 %v1462_v15, %v369_v32 }
  0x99   : > { %v405_v19 = vadd.f32 %v404_v27, %v373_v38  ;;  %v461_v35 = vadd.f32 %v460_v44, %v429_v39  ;;  %v388_v51 = vmul.f32 %v1343_v3, %v371_v34  ;;  %v1489_v61 = vmul.f32 %v1466_v24, %v370_v37  ;;  %v403_v44 = vld [vmem:[#allocation3] sm:$0x1] }
  0x9a   : > { %v517_v48 = vadd.f32 %v516_v47, %v485_v40  ;;  %v572_v23 = vadd.f32 %v540_v29, %v539_v43  ;;  %v389_v30 = vmul.f32 %v1346_v4, %v372_v17  ;;  %v390_v31 = vmul.f32 %v1349_v5, %v373_v38 }
  0x9b   : > { %v406_v49 = vadd.f32 %v405_v19, %v374_v14  ;;  %v462_v52 = vadd.f32 %v461_v35, %v430_v42  ;;  %v391_v2 = vmul.f32 %v1352_v6, %v374_v14  ;;  %v444_v56 = vmul.f32 %v1361_v8, %v427_v36 }
  0x9c   : > { %v518_v53 = vadd.f32 %v517_v48, %v486_v16  ;;  %v573_v15 = vadd.f32 %v572_v23, %v1485_v46  ;;  %v392_v54 = vadd.f32 %v389_v30, %v388_v51  ;;  %v445_v24 = vmul.f32 %v1365_v10, %v428_v26  ;;  %v515_v51 = vld [vmem:[#allocation3 + $0x2] sm:$0x1] }
  0x9d   : > { %v407_v3 = vrot.slane %v406_v49, 4  ;;  %v463_v57 = vrot.slane %v462_v52, 4  ;;  %v446_v58 = vmul.f32 %v1368_v11, %v429_v39  ;;  %v447_v5 = vmul.f32 %v1371_v12, %v430_v42 }
  0x9e   : > { %v519_v59 = vrot.slane %v518_v53, 4  ;;  %v574_v4 = vadd.f32 %v573_v15, %v1489_v61  ;;  %v393_v62 = vadd.f32 %v392_v54, %v390_v31  ;;  %v448_v1 = vadd.f32 %v445_v24, %v444_v56 }
  0x9f   : > { %v408_v63 = vadd.f32 %v407_v3, %v406_v49  ;;  %v464_v6 = vadd.f32 %v463_v57, %v462_v52  ;;  %v500_v9 = vmul.f32 %v1386_v18, %v483_v7  ;;  %v501_v0 = vmul.f32 %v1391_v21, %v484_v33 }
  0xa0   : > { %v520_v13 = vadd.f32 %v519_v59, %v518_v53  ;;  %v575_v55 = vrot.slane %v574_v4, 4  ;;  %v394_v8 = vadd.f32 %v393_v62, %v391_v2  ;;  %v449_v28 = vadd.f32 %v448_v1, %v446_v58  ;;  %v571_v2 = vld [vmem:[#allocation3 + $0x3] sm:$0x1] }
  0xa1   : > { %v409_v20 = vrot.slane %v408_v63, 2  ;;  %v465_v10 = vrot.slane %v464_v6, 2  ;;  %v502_v11 = vmul.f32 %v1394_v22, %v485_v40  ;;  %v503_v12 = vmul.f32 %v1400_v25, %v486_v16  ;;  %v459_v22 = vld [vmem:[#allocation3 + $0x1] sm:$0x1] }
  0xa2   : > { %v521_v32 = vrot.slane %v520_v13, 2  ;;  %v576_v34 = vadd.f32 %v575_v55, %v574_v4  ;;  %v395_v36 = vrot.slane %v394_v8, 4  ;;  %v450_v26 = vadd.f32 %v449_v28, %v447_v5 }
  0xa3   : > { %v410_v37 = vadd.f32 %v409_v20, %v408_v63  ;;  %v466_v17 = vadd.f32 %v465_v10, %v464_v6  ;;  %v504_v38 = vadd.f32 %v501_v0, %v500_v9  ;;  %v556_v14 = vmul.f32 %v1424_v41, %v539_v43  ;;  %v443_v63 = vld [vmem:[#allocation2 + $0x1] sm:$0x1]  ;;  %v499_v0 = vld [vmem:[#allocation2 + $0x2] sm:$0x1]  ;;  %v607_v10 = vld [vmem:[#allocation4] sm:$0xf] }
  0xa4   : > { %v522_v18 = vadd.f32 %v521_v32, %v520_v13  ;;  %v577_v7 = vrot.slane %v576_v34, 2  ;;  %v396_v39 = vadd.f32 %v395_v36, %v394_v8  ;;  %v451_v27 = vrot.slane %v450_v26, 4 }
  0xa5   : > { %v411_v21 = vrot.slane %v410_v37, 1  ;;  %v467_v33 = vrot.slane %v466_v17, 1  ;;  %v505_v42 = vadd.f32 %v504_v38, %v502_v11  ;;  %v557_v25 = vmul.f32 %v1434_v45, %v540_v29  ;;  %v387_v45 = vld [vmem:[#allocation2] sm:$0x1] }
  0xa6   : > { %v523_v40 = vrot.slane %v522_v18, 1  ;;  %v578_v47 = vadd.f32 %v577_v7, %v576_v34  ;;  %v397_v19 = vrot.slane %v396_v39, 2  ;;  %v452_v48 = vadd.f32 %v451_v27, %v450_v26 }
  0xa7   : > { %v412_v16 = vadd.f32 %v411_v21, %v410_v37  ;;  %v468_v35 = vadd.f32 %v467_v33, %v466_v17  ;;  %v506_v23 = vadd.f32 %v505_v42, %v503_v12  ;;  %v558_v41 = vmul.f32 %v1440_v50, %v1485_v46  ;;  %v555_v37 = vld [vmem:[#allocation2 + $0x3] sm:$0x1] }
  0xa8   : > { %v524_v30 = vadd.f32 %v523_v40, %v522_v18  ;;  %v579_v49 = vrot.slane %v578_v47, 1  ;;  %v398_v52 = vadd.f32 %v397_v19, %v396_v39  ;;  %v453_v53 = vrot.slane %v452_v48, 2 }
  0xa9   : > { %v413_v43 = vadd.f32 %v412_v16, %v403_v44  ;;  %v469_v31 = vadd.f32 %v468_v35, %v459_v22  ;;  %v507_v15 = vrot.slane %v506_v23, 4  ;;  %v559_v24 = vmul.f32 %v1453_v60, %v1489_v61 }
  0xaa   : > { %v525_v54 = vadd.f32 %v524_v30, %v515_v51  ;;  %v580_v56 = vadd.f32 %v579_v49, %v578_v47  ;;  %v399_v3 = vrot.slane %v398_v52, 1  ;;  %v454_v29 = vadd.f32 %v453_v53, %v452_v48 }
  0xab   : > { %414 = vst [vmem:[#allocation3] sm:$0x1] %v413_v43  ;;  %470 = vst [vmem:[#allocation3 + $0x1] sm:$0x1] %v469_v31  ;;  %v508_v57 = vadd.f32 %v507_v15, %v506_v23  ;;  %v560_v58 = vadd.f32 %v557_v25, %v556_v14  ;;  %v608_v36 = vsel %vm599_vm0, %v607_v10, 0.0  ;;  %v612_v39 = vlaneseq }
  0xac   : > { %526 = vst [vmem:[#allocation3 + $0x2] sm:$0x1] %v525_v54  ;;  %v581_v59 = vadd.f32 %v580_v56, %v571_v2  ;;  %v400_v50 = vadd.f32 %v399_v3, %v398_v52  ;;  %v455_v46 = vrot.slane %v454_v29, 1 }
  0xad   : > { %v509_v4 = vrot.slane %v508_v57, 2  ;;  %v561_v62 = vadd.f32 %v560_v58, %v558_v41  ;;  %v613_v14 = vand.u32 127, %v612_v39  ;;  %v615_v21 = vshrl.u32 %v612_v39, 7 }
  0xae   : > { %582 = vst [vmem:[#allocation3 + $0x3] sm:$0x1] %v581_v59  ;;  %v401_v5 = vadd.f32 %v400_v50, %v387_v45  ;;  %v456_v6 = vadd.f32 %v455_v46, %v454_v29 }
  0xaf   : > { %v510_v1 = vadd.f32 %v509_v4, %v508_v57  ;;  %v562_v9 = vadd.f32 %v561_v62, %v559_v24  ;;  %v616_v42 = vsub.s32 %v613_v14, %v615_v21 }
  0xb0   : > { %402 = vst [vmem:[#allocation2] sm:$0x1] %v401_v5  ;;  %v457_v13 = vadd.f32 %v456_v6, %v443_v63 }
  0xb1   : > { %v511_v55 = vrot.slane %v510_v1, 1  ;;  %v563_v8 = vrot.slane %v562_v9, 4 }
  0xb2   : > { %458 = vst [vmem:[#allocation2 + $0x1] sm:$0x1] %v457_v13 }
  0xb3   : > { %v512_v60 = vadd.f32 %v511_v55, %v510_v1  ;;  %v564_v61 = vadd.f32 %v563_v8, %v562_v9 }
  0xb5   : > { %v603_v20 = vld [vmem:[#allocation3] sm:$0xf]  ;;  %v513_v28 = vadd.f32 %v512_v60, %v499_v0  ;;  %v565_v11 = vrot.slane %v564_v61, 2 }
  0xb6   : > { %v604_v32 = vsel %vm599_vm0, %v603_v20, 0.0 }
  0xb7   : > { %605 = vadd.xlane.f32.xlu0 %v604_v32  ;;  %514 = vst [vmem:[#allocation2 + $0x2] sm:$0x1] %v513_v28  ;;  %v566_v34 = vadd.f32 %v565_v11, %v564_v61 }
  0xb9   : > { %v567_v12 = vrot.slane %v566_v34, 1 }
  0xbb   : > { %609 = vadd.xlane.f32.xlu0 %v608_v36  ;;  %v568_v17 = vadd.f32 %v567_v12, %v566_v34 }
  0xbd   : > { %v569_v26 = vadd.f32 %v568_v17, %v555_v37 }
  0xbf   : > { %570 = vst [vmem:[#allocation2 + $0x3] sm:$0x1] %v569_v26 }
  0xc6   : > { %v598_v38 = vld [vmem:[#allocation2] sm:$0xf] }
  0xc7   : > { %v600_v18 = vsel %vm599_vm0, %v598_v38, 0.0 }
  0xc8   : > { %601 = vadd.xlane.f32.xlu1 %v600_v18 }
 0x144   : > { %v606_v7 = vpop.xlane.xlu0 %605 }
 0x148   : > { %v610_v33 = vpop.xlane.xlu0 %609 }
 0x149   : > { %v621_v27 = vadd.f32 %v610_v33, %v606_v7 }
 0x155   : > { %v602_v44 = vpop.xlane.xlu1 %601 }
 0x156   : > { %v617_v22 = vrot.slane %v602_v44, %v616_v42  ;;  %v622_v40 = vsub.f32 %v621_v27, %v602_v44 }
 0x158   : > { %v627_v47 = vrot.slane %v622_v40, %v616_v42  ;;  %620 = vst.msk [vmem:[%s247_s4] sm:$0x1] %vm619_vm1, %v617_v22 }
 0x159   : > { %1010 = shalt.err (!%p1007_p9)
}
 0x15a   : > { %s1011_s29 = scalar_lea.hbm %s1521_s18, 16  ;;  %s1015_s19 = scalar_lea.hbm %s1605_s2, 32 }
 0x15b   : > { %p1012_p1 = scmp.ne.s32.totalorder %s1521_s18, %s1011_s29  ;;  %p1016_p5 = scmp.lt.u32.totalorder %s1521_s18, %s1605_s2 }
 0x15c   : > { %p1017_p13 = scmp.lt.u32.totalorder %s1015_s19, %s1011_s29  ;;  %p1019_p0 = scmp.lt.u32.totalorder %s1011_s29, %s1521_s18 }
 0x15d   : > { %p1013_p6 = pnand %p1012_p1, %p1618_p3 }
 0x15e   : > { %p1018_p8 = por %p1017_p13, %p1016_p5 }
 0x15f   : > { %p1014_p2 = pneg %p1013_p6 }
 0x160   : > { %p1020_p11 = por %p1019_p0, %p1018_p8 }
 0x162   : > { %p1021_p4 = pnand %p1020_p11, %p1014_p2 }
 0x164   : > { %1024 = shalt.err (!%p1021_p4)
}
 0x165   : > { %826 = dma.vmem_to_hbm [thread:$0]  (%p1618_p3), %s1523_s6, 16, %s1521_s18, %s631_s8   ;;  %629 = vst.msk [vmem:[%s253_s7] sm:$0x1] %vm619_vm1, %v627_v47 }
 0x166   : > { %s635_s22 = scalar_lea.sflag [#allocation12], %s1292_s30  ;;  %s1025_s10 = scalar_lea.vmem %s1531_s11, 16 }
 0x167   : > { %p1026_p7 = scmp.ne.s32.totalorder %s1531_s11, %s1025_s10  ;;  %s1123_s5 = smov [#allocation11]  }
 0x168   : > { %s1029_s9 = sshll.u32 %s1123_s5, 4  ;;  %s1030_s9 = int_to_ptr.vmem [resolvable:$false] %s1029_s9 }
 0x169   : > { %p1027_p10 = pnand %p1026_p7, %p1618_p3  ;;  %s1031_s21 = scalar_lea.vmem %s1030_s9, 32 }
 0x16a   : > { %p1032_p9 = scmp.lt.s32.totalorder %s1531_s11, %s1030_s9  ;;  %p1033_p1 = scmp.lt.s32.totalorder %s1031_s21, %s1025_s10 }
 0x16b   : > { %p1028_p12 = pneg %p1027_p10 }
 0x16c   : > { %p1034_p6 = por %p1033_p1, %p1032_p9 }
 0x16e   : > { %p1035_p2 = pnand %p1034_p6, %p1028_p12 }
 0x170   : > { %1038 = shalt.err (!%p1035_p2)
}
 0x171   : > { %s1039_s30 = scalar_lea.hbm %s1529_s23, 16  ;;  %s1043_s18 = scalar_lea.hbm %s1606_s3, 32 }
 0x172   : > { %p1040_p5 = scmp.ne.s32.totalorder %s1529_s23, %s1039_s30  ;;  %p1044_p0 = scmp.lt.u32.totalorder %s1529_s23, %s1606_s3 }
 0x173   : > { %p1045_p11 = scmp.lt.u32.totalorder %s1043_s18, %s1039_s30  ;;  %p1047_p7 = scmp.lt.u32.totalorder %s1039_s30, %s1529_s23 }
 0x174   : > { %p1041_p13 = pnand %p1040_p5, %p1618_p3 }
 0x175   : > { %p1046_p4 = por %p1045_p11, %p1044_p0 }
 0x176   : > { %p1042_p8 = pneg %p1041_p13 }
 0x177   : > { %p1048_p10 = por %p1047_p7, %p1046_p4 }
 0x179   : > { %p1049_p12 = pnand %p1048_p10, %p1042_p8 }
 0x17b   : > { %1052 = shalt.err (!%p1049_p12)
}
 0x17c   : > { %827 = dma.vmem_to_hbm [thread:$0]  (%p1618_p3), %s1531_s11, 16, %s1529_s23, %s635_s22  }
 0x17d PF: > { %s672_s24 = sand.u32 1, %s1095_s12   ;;  %p1619_p9 = scmp.ne.s32.totalorder %s1612_s27, 0 }
 0x17e   : > { %p1620_p1 = scmp.ge.s32.totalorder %s1115_s17, 2  ;;  %s673_s4 = scalar_lea.sflag [#allocation7], %s672_s24 }
 0x180   : > { %p838_p6 = pnand %p1620_p1, %p1619_p9 }
 0x182   : > { %1086 = dma.done.wait (!%p838_p6), %s673_s4, 16  }
 0x183   : > { %1088 = vsyncadd (!%p838_p6), %s673_s4, 4294967280  ;;  %s681_s19 = scalar_lea.sflag [#allocation12], %s672_s24 }
 0x184   : > { %1090 = dma.done.wait (!%p838_p6), %s681_s19, 16  }
 0x185   : > { %1092 = vsyncadd (!%p838_p6), %s681_s19, 4294967280  ;;  %s26_s17 = sadd.s32 1, %s1115_s17   ;;  %s1621_s12 = smov %s1099_s13 }
 0x186   : > { %p23_p2 = scmp.ge.s32.totalorder %s26_s17, 4   ;;  %s1622_s13 = smov %s1103_s14 }
 0x187   : > { %s1623_s14 = smov %s1200_s26  ;;  %s1624_s15 = smov %s1111_s16 }
 0x188   : > { %s1625_s16 = smov %s1627_s20  ;;  %25 = sbr.rel (!%p23_p2) target bundleno = 10 (0xa), region = 111 }
 0x18f   :  { %685 = vsyncpa [#allocation6], 1 }
 0x190   :  { %687 = vsyncpa [#allocation6 + $0x1], 1 }
 0x191   :  { %688 = vsyncpa [#allocation9], 1 }
 0x192   :  { %690 = vsyncpa [#allocation9 + $0x1], 1 }
 0x193   :  { %691 = vsyncpa [#allocation7], 1 }
 0x194   :  { %693 = vsyncpa [#allocation7 + $0x1], 1 }
 0x195   :  { %694 = vsyncpa [#allocation12], 1 }
 0x196   :  { %696 = vsyncpa [#allocation12 + $0x1], 1 }

</bundles_post_ra>
